<compile_context>
chip_gen: v6e
topology: v6e:2x2x1
jax: 0.10.0
libtpu: 0.0.40
codegen_flags: <defaults>
</compile_context>

<pallas_src>
import jax
import jax.numpy as jnp
from jax import lax
from jax.experimental import pallas as pl
from jax.experimental.pallas import tpu as pltpu


def _round_up(x, m):
    return ((x + m - 1) // m) * m


# ---------------------------------------------------------------------------
# Primary kernel: vectorized in-kernel gather (jnp.take) per batch tile.
# ---------------------------------------------------------------------------
def _mf_take_kernel(uid_ref, iid_ref, utab_ref, vtab_ref, o_ref):
    uids = uid_ref[0, :]                                       # (TB,) int32
    iids = iid_ref[0, :]
    u = jnp.take(utab_ref[...], uids, axis=0, mode="clip")     # (TB, D)
    v = jnp.take(vtab_ref[...], iids, axis=0, mode="clip")     # (TB, D)
    prod = u.astype(jnp.float32) * v.astype(jnp.float32)       # VPU (f32 math)
    o_ref[0, :] = jnp.sum(prod, axis=-1)                       # lane reduce


def _mf_call_vectorized(uid2d, iid2d, user_emb, item_emb, tb, vmem_limit):
    num_tiles = uid2d.shape[0]
    nu, d = user_emb.shape
    ni, _ = item_emb.shape
    return pl.pallas_call(
        _mf_take_kernel,
        out_shape=jax.ShapeDtypeStruct((num_tiles, tb), jnp.float32),
        grid=(num_tiles,),
        in_specs=[
            pl.BlockSpec((1, tb), lambda t: (t, 0)),    # user-id tile (VMEM)
            pl.BlockSpec((1, tb), lambda t: (t, 0)),    # item-id tile (VMEM)
            pl.BlockSpec((nu, d), lambda t: (0, 0)),    # user table, resident
            pl.BlockSpec((ni, d), lambda t: (0, 0)),    # item table, resident
        ],
        out_specs=pl.BlockSpec((1, tb), lambda t: (t, 0)),  # lane-dense ratings
        compiler_params=pltpu.CompilerParams(
            dimension_semantics=("parallel",),
            vmem_limit_bytes=vmem_limit),
    )(uid2d, iid2d, user_emb, item_emb)


# ---------------------------------------------------------------------------
# Fallback kernel: ids scalar-prefetched to SMEM, VMEM-local row-copy gather.
# ---------------------------------------------------------------------------
def _mf_loop_kernel(uid_sref, iid_sref, utab_ref, vtab_ref, o_ref,
                    ug_ref, vg_ref):
    t = pl.program_id(0)
    tb = o_ref.shape[1]       # static tile size
    base = t * tb

    def gather_row(b, carry):
        ug_ref[pl.ds(b, 1), :] = utab_ref[pl.ds(uid_sref[base + b], 1), :]
        vg_ref[pl.ds(b, 1), :] = vtab_ref[pl.ds(iid_sref[base + b], 1), :]
        return carry

    lax.fori_loop(0, tb, gather_row, 0)
    prod = ug_ref[...].astype(jnp.float32) * vg_ref[...].astype(jnp.float32)
    o_ref[0, :] = jnp.sum(prod, axis=-1)


def _mf_call_loop(uid_flat, iid_flat, user_emb, item_emb, tb, vmem_limit):
    num_tiles = uid_flat.shape[0] // tb
    nu, d = user_emb.shape
    ni, _ = item_emb.shape
    grid_spec = pltpu.PrefetchScalarGridSpec(
        num_scalar_prefetch=2,
        grid=(num_tiles,),
        in_specs=[
            pl.BlockSpec((nu, d), lambda t, u, i: (0, 0)),   # user table
            pl.BlockSpec((ni, d), lambda t, u, i: (0, 0)),   # item table
        ],
        out_specs=pl.BlockSpec((1, tb), lambda t, u, i: (t, 0)),
        scratch_shapes=[
            pltpu.VMEM((tb, d), user_emb.dtype),
            pltpu.VMEM((tb, d), item_emb.dtype),
        ],
    )
    return pl.pallas_call(
        _mf_loop_kernel,
        out_shape=jax.ShapeDtypeStruct((num_tiles, tb), jnp.float32),
        grid_spec=grid_spec,
        compiler_params=pltpu.CompilerParams(
            dimension_semantics=("parallel",),
            vmem_limit_bytes=vmem_limit),
    )(uid_flat, iid_flat, user_emb, item_emb)


# ---------------------------------------------------------------------------
# Wrapper
# ---------------------------------------------------------------------------
def mf_forward(x, user_emb, item_emb, *, tile_batch=512):
    """x: (B, 2) int ids; user_emb: (U, D); item_emb: (I, D) -> (B,) f32."""
    B = x.shape[0]
    _, d = user_emb.shape

    uid = x[:, 0].astype(jnp.int32)
    iid = x[:, 1].astype(jnp.int32)

    # Lane-dense tile size (multiple of 128), padded batch, tile count.
    tb = _round_up(min(tile_batch, _round_up(max(B, 1), 128)), 128)
    b_pad = _round_up(B, tb)
    num_tiles = b_pad // tb

    pad = b_pad - B
    uid_flat = jnp.pad(uid, (0, pad))   # pad with id 0 (valid row, discarded)
    iid_flat = jnp.pad(iid, (0, pad))
    uid2d = uid_flat.reshape(num_tiles, tb)
    iid2d = iid_flat.reshape(num_tiles, tb)

    # VMEM budget hint: resident tables + double-buffered id/output/gather
    # tiles + slack; capped at 48 MiB so this layout also fits v7x (64 MiB/TC).
    itemsize = jnp.dtype(user_emb.dtype).itemsize
    table_bytes = (user_emb.size + item_emb.size) * itemsize
    tile_bytes = 4 * tb * (2 * d * 4 + 3 * 4)
    vmem_limit = int(min(max(table_bytes + tile_bytes + (4 << 20), 32 << 20),
                         48 << 20))
    # TODO(synk): tables exceeding the VMEM budget need an HBM-resident
    # (memory_space=pl.ANY) double-buffered DMA-gather path; not implemented.

    try:
        out = _mf_call_vectorized(uid2d, iid2d, user_emb, item_emb, tb,
                                  vmem_limit)
        out = jax.block_until_ready(out)
    except Exception:
        # This JAX/Mosaic version can't lower the in-kernel jnp.take gather;
        # fall back to the VMEM-local row-copy loop (still tiled + resident).
        out = _mf_call_loop(uid_flat, iid_flat, user_emb, item_emb, tb,
                            vmem_limit)

    return out.reshape(-1)[:B]


if __name__ == "__main__":
    # model_configs (small, consistent with the module's __init__)
    num_users, num_items, embedding_size = 16, 24, 32
    B = 8

    key = jax.random.PRNGKey(0)
    ku, ki, kxu, kxi = jax.random.split(key, 4)

    # torch.nn.Embedding default init is N(0, 1) — reproduce deterministically.
    user_emb = jax.random.normal(ku, (num_users, embedding_size), jnp.float32)
    item_emb = jax.random.normal(ki, (num_items, embedding_size), jnp.float32)

    uid = jax.random.randint(kxu, (B,), 0, num_users, dtype=jnp.int32)
    iid = jax.random.randint(kxi, (B,), 0, num_items, dtype=jnp.int32)
    x = jnp.stack([uid, iid], axis=1)            # (B, 2), like the torch input

    rating = mf_forward(x, user_emb, item_emb)
    rating = jax.block_until_ready(rating)

    # Pure-JAX reference for correctness.
    ref = jnp.sum(user_emb[uid] * item_emb[iid], axis=1)
    assert rating.shape == (B,), rating.shape
    assert jnp.allclose(rating, ref, atol=1e-5, rtol=1e-5), (rating, ref)

    print("KERNEL_OK")
</pallas_src>

<mosaic_0001>
module attributes {stable_mosaic.version = 11 : i64} {
  func.func @_mf_loop_kernel(%arg0: i32, %arg1: memref<128xi32, #tpu.memory_space<smem>>, %arg2: memref<128xi32, #tpu.memory_space<smem>>, %arg3: memref<16x32xf32, #tpu.memory_space<vmem>>, %arg4: memref<24x32xf32, #tpu.memory_space<vmem>>, %arg5: memref<1x128xf32, #tpu.memory_space<vmem>>, %arg6: memref<128x32xf32, #tpu.memory_space<vmem>>, %arg7: memref<128x32xf32, #tpu.memory_space<vmem>>) attributes {dimension_semantics = [#tpu.dimension_semantics<parallel>], iteration_bounds = array<i64: 1>, scalar_prefetch = 2 : i64, scratch_operands = 2 : i64, tpu.core_type = #tpu.core_type<tc>, window_params = [{pipeline_mode = #tpu.pipeline_mode<synchronous>, transform_indices = @transform_0, window_bounds = array<i64: 16, 32>}, {pipeline_mode = #tpu.pipeline_mode<synchronous>, transform_indices = @transform_1, window_bounds = array<i64: 24, 32>}, {transform_indices = @transform_2, window_bounds = array<i64: 1, 128>}]} {
    %c128_i32 = arith.constant 128 : i32
    %0 = arith.muli %arg0, %c128_i32 : i32
    %c0_i32 = arith.constant 0 : i32
    %c128_i32_0 = arith.constant 128 : i32
    %1 = arith.addi %c0_i32, %c128_i32_0 : i32
    %c1_i32 = arith.constant 1 : i32
    scf.for %arg8 = %c0_i32 to %1 step %c1_i32  : i32 {
      %9 = arith.addi %0, %arg8 : i32
      %10 = arith.index_cast %9 : i32 to index
      %11 = memref.load %arg1[%10] : memref<128xi32, #tpu.memory_space<smem>>
      %12 = arith.index_cast %11 : i32 to index
      %c0_7 = arith.constant 0 : index
      %13 = vector.load %arg3[%12, %c0_7] : memref<16x32xf32, #tpu.memory_space<vmem>>, vector<1x32xf32>
      %14 = arith.index_cast %arg8 : i32 to index
      %c0_8 = arith.constant 0 : index
      %15 = vector.load %arg6[%14, %c0_8] : memref<128x32xf32, #tpu.memory_space<vmem>>, vector<1x32xf32>
      tpu.vector_store %arg6[%14, %c0_8], %13 {strides = array<i32>} : memref<128x32xf32, #tpu.memory_space<vmem>>, vector<1x32xf32>,
      %16 = arith.addi %0, %arg8 : i32
      %17 = arith.index_cast %16 : i32 to index
      %18 = memref.load %arg2[%17] : memref<128xi32, #tpu.memory_space<smem>>
      %19 = arith.index_cast %18 : i32 to index
      %c0_9 = arith.constant 0 : index
      %20 = vector.load %arg4[%19, %c0_9] : memref<24x32xf32, #tpu.memory_space<vmem>>, vector<1x32xf32>
      %21 = arith.index_cast %arg8 : i32 to index
      %c0_10 = arith.constant 0 : index
      %22 = vector.load %arg7[%21, %c0_10] : memref<128x32xf32, #tpu.memory_space<vmem>>, vector<1x32xf32>
      tpu.vector_store %arg7[%21, %c0_10], %20 {strides = array<i32>} : memref<128x32xf32, #tpu.memory_space<vmem>>, vector<1x32xf32>,
    }
    %c128_i32_1 = arith.constant 128 : i32
    %c0 = arith.constant 0 : index
    %c0_2 = arith.constant 0 : index
    %2 = vector.load %arg6[%c0, %c0_2] : memref<128x32xf32, #tpu.memory_space<vmem>>, vector<128x32xf32>
    %c0_3 = arith.constant 0 : index
    %c0_4 = arith.constant 0 : index
    %3 = vector.load %arg7[%c0_3, %c0_4] : memref<128x32xf32, #tpu.memory_space<vmem>>, vector<128x32xf32>
    %4 = arith.mulf %2, %3 : vector<128x32xf32>
    %cst = arith.constant dense<0.000000e+00> : vector<128xf32>
    %5 = vector.multi_reduction <add>, %4, %cst [1] : vector<128x32xf32> to vector<128xf32>
    %c0_5 = arith.constant 0 : index
    %c0_6 = arith.constant 0 : index
    %6 = vector.load %arg5[%c0_5, %c0_6] : memref<1x128xf32, #tpu.memory_space<vmem>>, vector<1x128xf32>
    %7 = vector.shape_cast %6 : vector<1x128xf32> to vector<128xf32>
    %8 = vector.shape_cast %5 : vector<128xf32> to vector<1x128xf32>
    tpu.vector_store %arg5[%c0_5, %c0_6], %8 {strides = array<i32>} : memref<1x128xf32, #tpu.memory_space<vmem>>, vector<1x128xf32>,
    return
  }
  func.func @transform_0(%arg0: i32, %arg1: memref<128xi32, #tpu.memory_space<smem>>, %arg2: memref<128xi32, #tpu.memory_space<smem>>) -> (i32, i32) {
    %c0_i32 = arith.constant 0 : i32
    %c0_i32_0 = arith.constant 0 : i32
    %c0_i32_1 = arith.constant 0 : i32
    return %c0_i32, %c0_i32_0 : i32, i32
  }
  func.func @transform_1(%arg0: i32, %arg1: memref<128xi32, #tpu.memory_space<smem>>, %arg2: memref<128xi32, #tpu.memory_space<smem>>) -> (i32, i32) {
    %c0_i32 = arith.constant 0 : i32
    %c0_i32_0 = arith.constant 0 : i32
    %c0_i32_1 = arith.constant 0 : i32
    return %c0_i32, %c0_i32_0 : i32, i32
  }
  func.func @transform_2(%arg0: i32, %arg1: memref<128xi32, #tpu.memory_space<smem>>, %arg2: memref<128xi32, #tpu.memory_space<smem>>) -> (i32, i32) {
    %c0_i32 = arith.constant 0 : i32
    %c0_i32_0 = arith.constant 0 : i32
    return %arg0, %c0_i32 : i32, i32
  }
}

</mosaic_0001>

<bundles_post_ra>
// kernel: tpu_custom_call.1
= control target key start
LH: loop header
LB: loop body
LE: loop exit
PB: predicated region body
PF: predicated region fallthrough
CT: control target
= control target key end

     0   :  { %s431_s15 = smov [#allocation5]   ;;  %s530_s0 = inlined_call_operand.hbm [shape: s32[128], index: 0, kind: input, shape index: {}]   ;;  %s531_s2 = inlined_call_operand.hbm [shape: f32[16,32], index: 2, kind: input, shape index: {}]   ;;  %s532_s3 = inlined_call_operand.hbm [shape: f32[24,32], index: 3, kind: input, shape index: {}]   ;;  %s533_s4 = inlined_call_operand.hbm [shape: f32[1,128], index: 4, kind: output, shape index: {}]   ;;  %s534_s1 = inlined_call_operand.vmem [shape: s32[128], index: 1, kind: input, shape index: {}]  }
   0x1   :  { %10 = dma.hbm_to_smem %s530_s0, 16, %s431_s15, [#allocation4] }
   0x2   :  { %s11_s20 = sshll.u32 %s534_s1, 4  ;;  %s12_s20 = int_to_ptr.vmem [resolvable:$true] %s11_s20 }
   0x3   :  { %s343_s21 = scalar_lea.vmem %s12_s20, 16  ;;  %p348_p1 = scmp.lt.s32.totalorder %s12_s20, %s12_s20 }
   0x4   :  { %p344_p0 = scmp.ne.s32.totalorder %s12_s20, %s343_s21  ;;  %p349_p2 = scmp.lt.s32.totalorder %s343_s21, %s343_s21 }
   0x6   :  { %p350_p3 = por %p349_p2, %p348_p1 }
   0x8   :  { %p351_p4 = pnand %p350_p3, %p344_p0 }
   0xa   :  { %354 = shalt.err (!%p351_p4)  }
   0xb   :  { %s432_s22 = smov [#allocation6]  }
   0xc   :  { %14 = dma.vmem_to_smem %s12_s20, 16, %s432_s22, [#allocation4] }
   0xd   :  { %419 = dma.done.wait [#allocation4], 32 }
   0xe   :  { %420 = vsyncadd [#allocation4], 4294967264 }
   0xf   :  { %16 = sfence }
  0x10   :  { %17 = vsyncpa [#allocation8], 0 }
  0x11   :  { %18 = vsyncpa [#allocation11], 0 }
  0x12   :  { %19 = vsyncpa [#allocation9], 0  ;;  %s433_s0 = smov [#allocation7]  }
  0x13   :  { %s25_s23 = sshll.u32 %s433_s0, 4  ;;  %s26_s23 = int_to_ptr.vmem [resolvable:$true] %s25_s23 }
  0x14   :  { %s363_s1 = scalar_lea.vmem %s26_s23, 256  ;;  %p368_p6 = scmp.lt.s32.totalorder %s26_s23, %s26_s23 }
  0x15   :  { %p364_p5 = scmp.ne.s32.totalorder %s26_s23, %s363_s1  ;;  %p369_p7 = scmp.lt.s32.totalorder %s363_s1, %s363_s1 }
  0x17   :  { %p370_p8 = por %p369_p7, %p368_p6 }
  0x19   :  { %p371_p9 = pnand %p370_p8, %p364_p5 }
  0x1b   :  { %374 = shalt.err (!%p371_p9)
}
  0x1c   :  { %s434_s24 = smov 128   ;;  %s435_s25 = smov 8  }
  0x1d   :  { %31 = dma.hbm_to_vmem [thread:$0]  %s531_s2, 256, %s26_s23, [#allocation8], %s434_s24, %s434_s24, %s435_s25  }
  0x1e   :  { %s436_s28 = smov [#allocation10]  }
  0x1f   :  { %s37_s29 = sshll.u32 %s436_s28, 4  ;;  %s38_s29 = int_to_ptr.vmem [resolvable:$true] %s37_s29 }
  0x20   :  { %s383_s30 = scalar_lea.vmem %s38_s29, 384  ;;  %p388_p11 = scmp.lt.s32.totalorder %s38_s29, %s38_s29 }
  0x21   :  { %p384_p10 = scmp.ne.s32.totalorder %s38_s29, %s383_s30  ;;  %p389_p12 = scmp.lt.s32.totalorder %s383_s30, %s383_s30 }
  0x23   :  { %p390_p13 = por %p389_p12, %p388_p11 }
  0x25   :  { %p391_p0 = pnand %p390_p13, %p384_p10 }
  0x27   :  { %394 = shalt.err (!%p391_p0)
}
  0x28   :  { %43 = dma.hbm_to_vmem [thread:$0]  %s532_s3, 384, %s38_s29, [#allocation11], %s434_s24, %s434_s24, %s435_s25  }
  0x29   :  { %421 = dma.done.wait [#allocation8], 256  }
  0x2a   :  { %422 = vsyncadd [#allocation8], 4294967040 }
  0x2b   :  { %423 = dma.done.wait [#allocation11], 384  }
  0x2c   :  { %424 = vsyncadd [#allocation11], 4294966912  ;;  %s427_s7 = smov 0  }
  0x2d LB: > { %s58_s2 = sld [smem:[#allocation5 + %s429_s7]]  ;;  %vm62_vm0 = vcmask 253952   ;;  %s61_s10 = scalar_lea.vmem [#allocation2], %s429_s7  ;;  %s429_s7 = sphi %s427_s7, %s56_s7  }
  0x2e   : > { %s64_s8 = sld [smem:[#allocation6 + %s429_s7]]  ;;  %s67_s12 = scalar_lea.vmem [#allocation3], %s429_s7 }
  0x2f   : > { %s56_s7 = sadd.s32 1, %s429_s7  }
  0x30   : > { %p53_p1 = scmp.ge.s32.totalorder %s56_s7, 128  }
  0x31   :  { %vm117_vm1 = vcmask (%p53_p1), 261120   ;;  %vm193_vm2 = vcmask (%p53_p1), 130112   ;;  %vm200_vm3 = vcmask (%p53_p1), 195712   ;;  %vm207_vm4 = vcmask (%p53_p1), 261312   ;;  %s437_s3 = smov (%p53_p1), [#allocation12]  }
  0x32   :  { %55 = sbr.rel (!%p53_p1) target bundleno = 45 (0x2d), region = 47  ;;  %vm214_vm5 = vcmask (%p53_p1), 326912   ;;  %vm221_vm6 = vcmask (%p53_p1), 392512   ;;  %vm228_vm7 = vcmask (%p53_p1), 458112   ;;  %vm235_vm8 = vcmask (%p53_p1), 523712   ;;  %s301_s13 = sshll.u32 (%p53_p1), %s437_s3, 4  ;;  %s302_s13 = int_to_ptr.vmem [resolvable:$true] %s301_s13 }
  0x33   : > { %s59_s9 = scalar_lea.vmem [#allocation7], %s58_s2  ;;  %vm242_vm9 = vcmask (%p53_p1), 589312   ;;  %vm249_vm10 = vcmask (%p53_p1), 654912   ;;  %vm256_vm11 = vcmask (%p53_p1), 720512   ;;  %vm263_vm12 = vcmask (%p53_p1), 786112   ;;  %s395_s14 = scalar_lea.vmem (%p53_p1), %s302_s13, 16 }
  0x34   : > { %v60_v0 = vld [vmem:[%s59_s9] sm:$0x1]  ;;  %s65_s11 = scalar_lea.vmem [#allocation10], %s64_s8  ;;  %vm270_vm13 = vcmask (%p53_p1), 851712   ;;  %vm277_vm14 = vcmask (%p53_p1), 917312   ;;  %vm284_vm15 = vcmask (%p53_p1), 982912   ;;  %p396_p2 = scmp.ne.s32.totalorder (%p53_p1), %s302_s13, %s395_s14 }
  0x35   : > { %63 = vst.msk [vmem:[%s61_s10] sm:$0x1] %vm62_vm0, %v60_v0  ;;  %v66_v1 = vld [vmem:[%s65_s11] sm:$0x1]  ;;  %s399_s15 = scalar_lea.vmem (%p53_p1), %s302_s13, 32  ;;  %p400_p3 = scmp.lt.s32.totalorder (%p53_p1), %s302_s13, %s302_s13 }
  0x36   : > { %68 = vst.msk [vmem:[%s67_s12] sm:$0x1] %vm62_vm0, %v66_v1  ;;  %vm291_vm0 = vcmask (%p53_p1), 1048512   ;;  %p401_p4 = scmp.lt.s32.totalorder (%p53_p1), %s399_s15, %s395_s14 }
  0x38   :  { %p402_p5 = por %p401_p4, %p400_p3 }
  0x3a   :  { %p403_p6 = pnand %p402_p5, %p396_p2 }
  0x3c   :  { %v69_v2 = vld [vmem:[#allocation2] sm:$0xff]  ;;  %v71_v4 = vld [vmem:[#allocation2 + $0x10] sm:$0xff]  ;;  %v70_v7 = vld [vmem:[#allocation2 + $0x8] sm:$0xff] }
  0x3d   :  { %v85_v3 = vld [vmem:[#allocation3] sm:$0xff]  ;;  %v87_v6 = vld [vmem:[#allocation3 + $0x10] sm:$0xff]  ;;  %v86_v8 = vld [vmem:[#allocation3 + $0x8] sm:$0xff] }
  0x3e   :  { %v101_v5 = vmul.f32 %v85_v3, %v69_v2  ;;  %v103_v9 = vmul.f32 %v87_v6, %v71_v4  ;;  %v102_v10 = vmul.f32 %v86_v8, %v70_v7  ;;  %v72_v11 = vld [vmem:[#allocation2 + $0x18] sm:$0xff]  ;;  %v73_v13 = vld [vmem:[#allocation2 + $0x20] sm:$0xff]  ;;  %v74_v17 = vld [vmem:[#allocation2 + $0x28] sm:$0xff]  ;;  %v182_v2 = vlaneseq }
  0x3f   :  { %v88_v12 = vld [vmem:[#allocation3 + $0x18] sm:$0xff]  ;;  %v89_v16 = vld [vmem:[#allocation3 + $0x20] sm:$0xff]  ;;  %v90_v18 = vld [vmem:[#allocation3 + $0x28] sm:$0xff] }
  0x40   :  { %v118_v14 = vsel %vm117_vm1, %v101_v5, 0.0  ;;  %v104_v15 = vmul.f32 %v88_v12, %v72_v11  ;;  %v124_v19 = vsel %vm117_vm1, %v103_v9, 0.0  ;;  %v121_v20 = vsel %vm117_vm1, %v102_v10, 0.0  ;;  %v75_v24 = vld [vmem:[#allocation2 + $0x30] sm:$0xff]  ;;  %v76_v26 = vld [vmem:[#allocation2 + $0x38] sm:$0xff]  ;;  %v77_v32 = vld [vmem:[#allocation2 + $0x40] sm:$0xff] }
  0x41   :  { %119 = vadd.xlane.f32.xlu0 %v118_v14  ;;  %125 = vadd.xlane.f32.xlu1 %v124_v19  ;;  %v105_v21 = vmul.f32 %v89_v16, %v73_v13  ;;  %v106_v23 = vmul.f32 %v90_v18, %v74_v17  ;;  %v91_v25 = vld [vmem:[#allocation3 + $0x30] sm:$0xff]  ;;  %v92_v27 = vld [vmem:[#allocation3 + $0x38] sm:$0xff]  ;;  %v93_v33 = vld [vmem:[#allocation3 + $0x40] sm:$0xff]  ;;  %v491_v3 = vand.u32 127, %v182_v2  ;;  %v493_v4 = vshrl.u32 %v182_v2, 7 }
  0x42   :  { %v127_v22 = vsel %vm117_vm1, %v104_v15, 0.0  ;;  %v107_v29 = vmul.f32 %v91_v25, %v75_v24  ;;  %v108_v31 = vmul.f32 %v92_v27, %v76_v26  ;;  %v78_v34 = vld [vmem:[#allocation2 + $0x48] sm:$0xff]  ;;  %v109_v37 = vmul.f32 %v93_v33, %v77_v32  ;;  %v79_v40 = vld [vmem:[#allocation2 + $0x50] sm:$0xff]  ;;  %v80_v42 = vld [vmem:[#allocation2 + $0x58] sm:$0xff] }
  0x43   :  { %v130_v28 = vsel %vm117_vm1, %v105_v21, 0.0  ;;  %v133_v30 = vsel %vm117_vm1, %v106_v23, 0.0  ;;  %v94_v35 = vld [vmem:[#allocation3 + $0x48] sm:$0xff]  ;;  %v95_v41 = vld [vmem:[#allocation3 + $0x50] sm:$0xff]  ;;  %v96_v43 = vld [vmem:[#allocation3 + $0x58] sm:$0xff]  ;;  %v188_v5 = vadd.s32 4294967288, %v491_v3  ;;  %v186_v9 = vsub.s32 %v491_v3, %v493_v4 }
  0x44   :  { %v136_v36 = vsel %vm117_vm1, %v107_v29, 0.0  ;;  %v139_v38 = vsel %vm117_vm1, %v108_v31, 0.0  ;;  %v110_v39 = vmul.f32 %v94_v35, %v78_v34  ;;  %v142_v44 = vsel %vm117_vm1, %v109_v37, 0.0  ;;  %v81_v48 = vld [vmem:[#allocation2 + $0x60] sm:$0xff]  ;;  %v82_v50 = vld [vmem:[#allocation2 + $0x68] sm:$0xff]  ;;  %v83_v56 = vld [vmem:[#allocation2 + $0x70] sm:$0xff] }
  0x45   :  { %122 = vadd.xlane.f32.xlu0 %v121_v20  ;;  %128 = vadd.xlane.f32.xlu1 %v127_v22  ;;  %v111_v45 = vmul.f32 %v95_v41, %v79_v40  ;;  %v112_v47 = vmul.f32 %v96_v43, %v80_v42  ;;  %v97_v49 = vld [vmem:[#allocation3 + $0x60] sm:$0xff]  ;;  %v98_v51 = vld [vmem:[#allocation3 + $0x68] sm:$0xff]  ;;  %v99_v57 = vld [vmem:[#allocation3 + $0x70] sm:$0xff]  ;;  %v195_v6 = vadd.s32 4294967280, %v491_v3  ;;  %v202_v7 = vadd.s32 4294967272, %v491_v3 }
  0x46   :  { %v145_v46 = vsel %vm117_vm1, %v110_v39, 0.0  ;;  %v113_v53 = vmul.f32 %v97_v49, %v81_v48  ;;  %v114_v55 = vmul.f32 %v98_v51, %v82_v50  ;;  %v84_v58 = vld [vmem:[#allocation2 + $0x78] sm:$0xff]  ;;  %v115_v61 = vmul.f32 %v99_v57, %v83_v56 }
  0x47   :  { %v148_v52 = vsel %vm117_vm1, %v111_v45, 0.0  ;;  %v151_v54 = vsel %vm117_vm1, %v112_v47, 0.0  ;;  %v100_v59 = vld [vmem:[#allocation3 + $0x78] sm:$0xff]  ;;  %v191_v11 = vsub.s32 %v188_v5, %v493_v4  ;;  %v209_v12 = vadd.s32 4294967264, %v491_v3 }
  0x48   :  { %v154_v60 = vsel %vm117_vm1, %v113_v53, 0.0  ;;  %v157_v62 = vsel %vm117_vm1, %v114_v55, 0.0  ;;  %v116_v63 = vmul.f32 %v100_v59, %v84_v58  ;;  %v160_v0 = vsel %vm117_vm1, %v115_v61, 0.0 }
  0x49   :  { %131 = vadd.xlane.f32.xlu0 %v130_v28  ;;  %134 = vadd.xlane.f32.xlu1 %v133_v30  ;;  %v198_v13 = vsub.s32 %v195_v6, %v493_v4  ;;  %v205_v14 = vsub.s32 %v202_v7, %v493_v4  ;;  %v216_v15 = vadd.s32 4294967256, %v491_v3  ;;  %v212_v20 = vsub.s32 %v209_v12, %v493_v4 }
  0x4a   :  { %v163_v1 = vsel %vm117_vm1, %v116_v63, 0.0  ;;  %v223_v21 = vadd.s32 4294967248, %v491_v3  ;;  %v230_v25 = vadd.s32 4294967240, %v491_v3  ;;  %v237_v33 = vadd.s32 4294967232, %v491_v3 }
  0x4b   :  { %v219_v24 = vsub.s32 %v216_v15, %v493_v4  ;;  %v251_v42 = vadd.s32 4294967216, %v491_v3  ;;  %v272_v56 = vadd.s32 4294967192, %v491_v3  ;;  %v286_v2 = vadd.s32 4294967176, %v491_v3 }
  0x4c   :  { %v226_v32 = vsub.s32 %v223_v21, %v493_v4  ;;  %v233_v35 = vsub.s32 %v230_v25, %v493_v4  ;;  %v240_v41 = vsub.s32 %v237_v33, %v493_v4 }
  0x4d   :  { %137 = vadd.xlane.f32.xlu0 %v136_v36  ;;  %140 = vadd.xlane.f32.xlu1 %v139_v38  ;;  %v244_v36 = vadd.s32 4294967224, %v491_v3  ;;  %v254_v51 = vsub.s32 %v251_v42, %v493_v4  ;;  %v289_v12 = vsub.s32 %v286_v2, %v493_v4 }
  0x4f   :  { %v247_v45 = vsub.s32 %v244_v36, %v493_v4 }
  0x51   :  { %143 = vadd.xlane.f32.xlu0 %v142_v44  ;;  %146 = vadd.xlane.f32.xlu1 %v145_v46  ;;  %v258_v46 = vadd.s32 4294967208, %v491_v3 }
  0x53   :  { %v261_v55 = vsub.s32 %v258_v46, %v493_v4 }
  0x55   :  { %149 = vadd.xlane.f32.xlu0 %v148_v52  ;;  %152 = vadd.xlane.f32.xlu1 %v151_v54  ;;  %v265_v52 = vadd.s32 4294967200, %v491_v3 }
  0x57   :  { %v268_v61 = vsub.s32 %v265_v52, %v493_v4 }
  0x59   :  { %155 = vadd.xlane.f32.xlu0 %v154_v60  ;;  %158 = vadd.xlane.f32.xlu1 %v157_v62  ;;  %v279_v62 = vadd.s32 4294967184, %v491_v3 }
  0x5d   :  { %161 = vadd.xlane.f32.xlu0 %v160_v0  ;;  %164 = vadd.xlane.f32.xlu1 %v163_v1  ;;  %v275_v1 = vsub.s32 %v272_v56, %v493_v4 }
  0xca   :  { %v120_v8 = vpop.xlane.xlu0 %119  ;;  %v126_v10 = vpop.xlane.xlu1 %125 }
  0xcb   :  { %v187_v17 = vrot.slane %v120_v8, %v186_v9  ;;  %v199_v22 = vrot.slane %v126_v10, %v198_v13  ;;  %v282_v9 = vsub.s32 %v279_v62, %v493_v4 }
  0xce   :  { %v123_v16 = vpop.xlane.xlu0 %122  ;;  %v129_v19 = vpop.xlane.xlu1 %128 }
  0xcf   :  { %v192_v18 = vrot.slane %v123_v16, %v191_v11  ;;  %v206_v23 = vrot.slane %v129_v19, %v205_v14 }
  0xd1   :  { %v194_v26 = vsel %vm193_vm2, %v192_v18, %v187_v17 }
  0xd2   :  { %v201_v27 = vsel %vm200_vm3, %v199_v22, %v194_v26  ;;  %v132_v28 = vpop.xlane.xlu0 %131  ;;  %v135_v31 = vpop.xlane.xlu1 %134 }
  0xd3   :  { %v208_v29 = vsel %vm207_vm4, %v206_v23, %v201_v27  ;;  %v213_v30 = vrot.slane %v132_v28, %v212_v20  ;;  %v220_v34 = vrot.slane %v135_v31, %v219_v24 }
  0xd5   :  { %v215_v37 = vsel %vm214_vm5, %v213_v30, %v208_v29 }
  0xd6   :  { %v138_v38 = vpop.xlane.xlu0 %137  ;;  %v141_v40 = vpop.xlane.xlu1 %140  ;;  %v222_v43 = vsel %vm221_vm6, %v220_v34, %v215_v37 }
  0xd7   :  { %v227_v39 = vrot.slane %v138_v38, %v226_v32  ;;  %v234_v44 = vrot.slane %v141_v40, %v233_v35 }
  0xd9   :  { %v229_v47 = vsel %vm228_vm7, %v227_v39, %v222_v43 }
  0xda   :  { %v144_v48 = vpop.xlane.xlu0 %143  ;;  %v147_v50 = vpop.xlane.xlu1 %146  ;;  %v236_v53 = vsel %vm235_vm8, %v234_v44, %v229_v47 }
  0xdb   :  { %v241_v49 = vrot.slane %v144_v48, %v240_v41  ;;  %v248_v54 = vrot.slane %v147_v50, %v247_v45 }
  0xdd   :  { %v243_v57 = vsel %vm242_vm9, %v241_v49, %v236_v53 }
  0xde   :  { %v150_v58 = vpop.xlane.xlu0 %149  ;;  %v153_v60 = vpop.xlane.xlu1 %152  ;;  %v250_v63 = vsel %vm249_vm10, %v248_v54, %v243_v57 }
  0xdf   :  { %v255_v59 = vrot.slane %v150_v58, %v254_v51  ;;  %v262_v0 = vrot.slane %v153_v60, %v261_v55 }
  0xe1   :  { %v257_v5 = vsel %vm256_vm11, %v255_v59, %v250_v63 }
  0xe2   :  { %v156_v6 = vpop.xlane.xlu0 %155  ;;  %v159_v8 = vpop.xlane.xlu1 %158  ;;  %v264_v10 = vsel %vm263_vm12, %v262_v0, %v257_v5 }
  0xe3   :  { %v269_v7 = vrot.slane %v156_v6, %v268_v61  ;;  %v276_v11 = vrot.slane %v159_v8, %v275_v1 }
  0xe5   :  { %v271_v13 = vsel %vm270_vm13, %v269_v7, %v264_v10 }
  0xe6   :  { %v162_v14 = vpop.xlane.xlu0 %161  ;;  %v165_v3 = vpop.xlane.xlu1 %164  ;;  %v278_v16 = vsel %vm277_vm14, %v276_v11, %v271_v13 }
  0xe7   :  { %v283_v15 = vrot.slane %v162_v14, %v282_v9  ;;  %v290_v17 = vrot.slane %v165_v3, %v289_v12 }
  0xe9   :  { %v285_v18 = vsel %vm284_vm15, %v283_v15, %v278_v16 }
  0xea   :  { %v292_v19 = vsel %vm291_vm0, %v290_v17, %v285_v18 }
  0xeb   :  { %294 = vst [vmem:[#allocation12] sm:$0x1] %v292_v19 }
  0xec   :  { %406 = shalt.err (!%p403_p6)
}
  0xed   :  { %304 = dma.vmem_to_hbm [thread:$0]  %s302_s13, 16, %s533_s4, [#allocation9]  }
  0xee   :  { %425 = dma.done.wait [#allocation9], 16  }
  0xef   :  { %426 = vsyncadd [#allocation9], 4294967280 }
  0xf0   :  { %308 = vsyncpa [#allocation8], 1 }
  0xf1   :  { %309 = vsyncpa [#allocation11], 1 }
  0xf2   :  { %310 = vsyncpa [#allocation9], 1 }

</bundles_post_ra>
